<compile_context>
chip_gen: v6e
topology: v6e:2x2x1
jax: 0.10.0
libtpu: 0.0.40
codegen_flags: <defaults>
</compile_context>

<pallas_src>
import jax
import jax.numpy as jnp
from jax.experimental import pallas as pl
from jax.experimental.pallas import tpu as pltpu


def _round_up(v: int, m: int) -> int:
    return ((v + m - 1) // m) * m


def _fused_heads_kernel(x_ref, w_ref, b_ref, o_ref):
    # x_ref: (tm, D_pad)     bf16  -- row tile of the stacked query tokens
    # w_ref: (D_pad, C_pad)  bf16  -- all heads' weights, classes concatenated
    # b_ref: (1, C_pad)      f32   -- concatenated biases (zero-padded)
    # o_ref: (tm, C_pad)     f32   -- lane-dense output tile (C_pad % 128 == 0)
    acc = jnp.dot(x_ref[...], w_ref[...], preferred_element_type=jnp.float32)
    o_ref[...] = (acc + b_ref[...]).astype(o_ref.dtype)


def _pick_row_tile(m: int, d_pad: int, c_pad: int) -> int:
    """Largest 8-aligned row tile such that resident weights + double-buffered
    x/out tiles stay under ~24 MiB of VMEM (leaves headroom below the default
    scoped-VMEM limit on v5e/v6e/v7x)."""
    budget = 24 * 1024 * 1024
    fixed = d_pad * c_pad * 2 + 2 * c_pad * 4          # weights + bias (x2 buf)
    per_row = 2 * (d_pad * 2) + 2 * (c_pad * 4)        # x tile + out tile, x2 buf
    tm_cap = max((budget - fixed) // max(per_row, 1), 8)
    tm_cap = max((tm_cap // 8) * 8, 8)
    tm = _round_up(max(m, 8), 8) if m <= 256 else 256
    return min(tm, tm_cap)


def fused_linear_heads(x2d, w_cat, b_cat):
    """out = x2d @ w_cat + b_cat in one Pallas launch.

    x2d:   (M, D)           f32 (padded to D_pad and cast to bf16 here)
    w_cat: (D_pad, C_pad)   bf16, D_pad % 128 == 0, C_pad % 128 == 0
    b_cat: (1, C_pad)       f32
    returns (M, C_pad)      f32
    """
    M, D = x2d.shape
    D_pad, C_pad = w_cat.shape

    tm = _pick_row_tile(M, D_pad, C_pad)
    M_pad = _round_up(M, tm)

    x_pad = x2d
    if (M_pad != M) or (D_pad != D):
        x_pad = jnp.pad(x2d, ((0, M_pad - M), (0, D_pad - D)))
    x_pad = x_pad.astype(jnp.bfloat16)

    grid = (M_pad // tm,)
    cost = pl.CostEstimate(
        flops=2 * M_pad * D_pad * C_pad,
        transcendentals=0,
        bytes_accessed=(M_pad * D_pad * 2          # x (bf16)
                        + D_pad * C_pad * 2        # W (bf16)
                        + C_pad * 4                # bias (f32)
                        + M_pad * C_pad * 4),      # out (f32)
    )

    out = pl.pallas_call(
        _fused_heads_kernel,
        out_shape=jax.ShapeDtypeStruct((M_pad, C_pad), jnp.float32),
        grid=grid,
        in_specs=[
            pl.BlockSpec((tm, D_pad), lambda i: (i, 0)),      # x row tile
            pl.BlockSpec((D_pad, C_pad), lambda i: (0, 0)),   # weights resident
            pl.BlockSpec((1, C_pad), lambda i: (0, 0)),       # bias resident
        ],
        out_specs=pl.BlockSpec((tm, C_pad), lambda i: (i, 0)),
        compiler_params=pltpu.CompilerParams(
            dimension_semantics=("parallel",)),
        cost_estimate=cost,
    )(x_pad, w_cat, b_cat)
    return out[:M]


class AudioVisualCLSHeadPallas:
    """JAX/Pallas re-implementation of AudioVisualCLSHead (all heads fused)."""

    def __init__(self, num_class, d_model, key):
        self.include_verb_noun = isinstance(num_class[0], (list, tuple))
        self.d_model = d_model

        def init_linear(k, out_features, in_features):
            kw, kb = jax.random.split(k)
            bound = 1.0 / jnp.sqrt(in_features)
            w = jax.random.uniform(kw, (out_features, in_features),
                                   jnp.float32, -bound, bound)
            b = jax.random.uniform(kb, (out_features,),
                                   jnp.float32, -bound, bound)
            return w, b

        keys = jax.random.split(key, 4)
        if self.include_verb_noun:
            self.w_vv, self.b_vv = init_linear(keys[0], num_class[0][0], d_model)
            self.w_vn, self.b_vn = init_linear(keys[1], num_class[0][1], d_model)
            self.w_va, self.b_va = init_linear(keys[2], num_class[0][2], d_model)
            heads = [(self.w_vv, self.b_vv),
                     (self.w_vn, self.b_vn),
                     (self.w_va, self.b_va)]
        else:
            self.w_vv = self.b_vv = None
            self.w_vn = self.b_vn = None
            self.w_va, self.b_va = init_linear(keys[2], num_class[0], d_model)
            heads = [(self.w_va, self.b_va)]
        self.w_aa, self.b_aa = init_linear(keys[3], num_class[1], d_model)
        heads.append((self.w_aa, self.b_aa))

        # Pre-transpose + concatenate ALL head weights once at init, padding
        # both the contraction dim (D -> D_pad) and the class dim (C -> C_pad)
        # up to multiples of 128 so every kernel access is lane-dense:
        #   w_cat: (D_pad, C_pad) bf16
        #   b_cat: (1, C_pad)     f32
        self.head_classes = [int(w.shape[0]) for w, _ in heads]
        c_total = sum(self.head_classes)
        self.c_pad = _round_up(max(c_total, 128), 128)
        self.d_pad = _round_up(max(d_model, 128), 128)
        w_cat = jnp.concatenate([w.T for w, _ in heads], axis=1)   # (D, C_total)
        b_cat = jnp.concatenate([b for _, b in heads], axis=0)     # (C_total,)
        self.w_cat = jnp.pad(
            w_cat,
            ((0, self.d_pad - d_model), (0, self.c_pad - c_total)),
        ).astype(jnp.bfloat16)
        self.b_cat = jnp.pad(b_cat, (0, self.c_pad - c_total)).reshape(
            1, self.c_pad)

        offs, o = [], 0
        for c in self.head_classes:
            offs.append(o)
            o += c
        self.col_offsets = offs

    def __call__(self, x, num_v_queries, num_a_queries):
        # x: (B, S, d_model); num_*_queries are static Python ints.
        B, S, D = x.shape
        aud_start = -num_a_queries if num_a_queries > 0 else S
        action_start = aud_start - num_v_queries

        # Collect each head's query-token rows (flatten (B, Nq, D)->(B*Nq, D))
        # and stack them so ALL heads share one Pallas launch.
        slabs = []
        if self.include_verb_noun:
            noun_start = action_start - num_v_queries
            verb_start = noun_start - num_v_queries
            slabs.append(x[:, verb_start:noun_start].reshape(-1, D))
            slabs.append(x[:, noun_start:action_start].reshape(-1, D))
        slabs.append(x[:, action_start:aud_start].reshape(-1, D))
        slabs.append(x[:, aud_start:].reshape(-1, D))
        row_counts = [s.shape[0] for s in slabs]
        m_total = sum(row_counts)

        if m_total == 0:
            # Degenerate case: no query tokens at all -> no kernel launch.
            empties = [jnp.zeros((0, c), dtype=x.dtype)
                       for c in self.head_classes]
            if self.include_verb_noun:
                return tuple(empties)
            return (None, None, empties[0], empties[1])

        x_rows = jnp.concatenate(slabs, axis=0)                     # (M, D)
        out = fused_linear_heads(x_rows, self.w_cat, self.b_cat)    # (M, C_pad)
        out = out.astype(x.dtype)

        preds, r = [], 0
        for rc, c, co in zip(row_counts, self.head_classes, self.col_offsets):
            preds.append(out[r:r + rc, co:co + c])
            r += rc

        if self.include_verb_noun:
            v_verb_preds, v_noun_preds, v_action_preds, a_action_preds = preds
        else:
            v_verb_preds = None
            v_noun_preds = None
            v_action_preds, a_action_preds = preds
        return (v_verb_preds, v_noun_preds, v_action_preds, a_action_preds)


def _reference(head, x, num_v_queries, num_a_queries, cast_bf16=False):
    """Pure-JAX reference (optionally with bf16 operands / f32 accumulate)."""
    B, S, D = x.shape
    aud_start = -num_a_queries if num_a_queries > 0 else S
    action_start = aud_start - num_v_queries

    def lin(xs, w, b):
        x2 = xs.reshape(-1, D)
        if cast_bf16:
            return jnp.dot(x2.astype(jnp.bfloat16), w.T.astype(jnp.bfloat16),
                           preferred_element_type=jnp.float32) + b
        return x2 @ w.T + b

    if head.include_verb_noun:
        noun_start = action_start - num_v_queries
        verb_start = noun_start - num_v_queries
        vv = lin(x[:, verb_start:noun_start], head.w_vv, head.b_vv)
        vn = lin(x[:, noun_start:action_start], head.w_vn, head.b_vn)
    else:
        vv = vn = None
    va = lin(x[:, action_start:aud_start], head.w_va, head.b_va)
    aa = lin(x[:, aud_start:], head.w_aa, head.b_aa)
    return vv, vn, va, aa


if __name__ == "__main__":
    key = jax.random.PRNGKey(0)
    k_param, k_x = jax.random.split(key)

    # Small shapes consistent with the module's forward:
    #   num_class = [[verb, noun, action], audio_action], d_model = 32
    num_class = [[10, 12, 15], 8]
    d_model = 32
    B = 2
    num_v_queries = 4
    num_a_queries = 4
    S = 20  # >= 3*num_v_queries + num_a_queries

    head = AudioVisualCLSHeadPallas(num_class, d_model, k_param)
    x = jax.random.normal(k_x, (B, S, d_model), dtype=jnp.float32)

    out = head(x, num_v_queries, num_a_queries)
    out = jax.block_until_ready(out)

    # Tight check vs a JAX reference using the same bf16 operands / f32 acc.
    ref_bf16 = _reference(head, x, num_v_queries, num_a_queries, cast_bf16=True)
    for o, r in zip(out, ref_bf16):
        assert o.shape == r.shape, (o.shape, r.shape)
        assert jnp.allclose(o, r, atol=1e-3, rtol=1e-3), \
            float(jnp.max(jnp.abs(o - r)))

    # Loose check vs the exact f32 module semantics (only bf16 operand
    # quantization separates them).
    ref_f32 = _reference(head, x, num_v_queries, num_a_queries, cast_bf16=False)
    for o, r in zip(out, ref_f32):
        assert jnp.allclose(o, r, atol=5e-2, rtol=5e-2), \
            float(jnp.max(jnp.abs(o - r)))

    # Shape checks matching PyTorch semantics.
    assert out[0].shape == (B * num_v_queries, num_class[0][0])
    assert out[1].shape == (B * num_v_queries, num_class[0][1])
    assert out[2].shape == (B * num_v_queries, num_class[0][2])
    assert out[3].shape == (B * num_a_queries, num_class[1])

    # Also exercise the no-verb-noun configuration once.
    head2 = AudioVisualCLSHeadPallas([11, 7], d_model, k_param)
    out2 = jax.block_until_ready(head2(x, num_v_queries, num_a_queries))
    assert out2[0] is None and out2[1] is None
    assert out2[2].shape == (B * num_v_queries, 11)
    assert out2[3].shape == (B * num_a_queries, 7)

    print("KERNEL_OK")
</pallas_src>

<mosaic_0001>
module attributes {stable_mosaic.version = 11 : i64} {
  func.func @_fused_heads_kernel(%arg0: i32, %arg1: memref<32x128xbf16, #tpu.memory_space<vmem>>, %arg2: memref<128x128xbf16, #tpu.memory_space<vmem>>, %arg3: memref<1x128xf32, #tpu.memory_space<vmem>>, %arg4: memref<32x128xf32, #tpu.memory_space<vmem>>) attributes {dimension_semantics = [#tpu.dimension_semantics<parallel>], iteration_bounds = array<i64: 1>, scalar_prefetch = 0 : i64, scratch_operands = 0 : i64, tpu.core_type = #tpu.core_type<tc>, window_params = [{transform_indices = @transform_0, window_bounds = array<i64: 32, 128>}, {pipeline_mode = #tpu.pipeline_mode<synchronous>, transform_indices = @transform_1, window_bounds = array<i64: 128, 128>}, {pipeline_mode = #tpu.pipeline_mode<synchronous>, transform_indices = @transform_2, window_bounds = array<i64: 1, 128>}, {transform_indices = @transform_3, window_bounds = array<i64: 32, 128>}]} {
    %c0 = arith.constant 0 : index
    %c0_0 = arith.constant 0 : index
    %0 = vector.load %arg1[%c0, %c0_0] : memref<32x128xbf16, #tpu.memory_space<vmem>>, vector<32x128xbf16>
    %c0_1 = arith.constant 0 : index
    %c0_2 = arith.constant 0 : index
    %1 = vector.load %arg2[%c0_1, %c0_2] : memref<128x128xbf16, #tpu.memory_space<vmem>>, vector<128x128xbf16>
    %cst = arith.constant dense<0.000000e+00> : vector<32x128xf32>
    %2 = tpu.matmul %0, %1, %cst {dimension_numbers = #tpu.dot_dimension_numbers<[1], [0], [0], [1], [0, 0, 1, 1], [], []>} : vector<32x128xbf16>, vector<128x128xbf16>, vector<32x128xf32> -> vector<32x128xf32>
    %c0_3 = arith.constant 0 : index
    %c0_4 = arith.constant 0 : index
    %3 = vector.load %arg3[%c0_3, %c0_4] : memref<1x128xf32, #tpu.memory_space<vmem>>, vector<1x128xf32>
    %4 = vector.broadcast %3 : vector<1x128xf32> to vector<32x128xf32>
    %5 = arith.addf %2, %4 : vector<32x128xf32>
    %c0_5 = arith.constant 0 : index
    %c0_6 = arith.constant 0 : index
    %6 = vector.load %arg4[%c0_5, %c0_6] : memref<32x128xf32, #tpu.memory_space<vmem>>, vector<32x128xf32>
    tpu.vector_store %arg4[%c0_5, %c0_6], %5 {strides = array<i32>} : memref<32x128xf32, #tpu.memory_space<vmem>>, vector<32x128xf32>,
    return
  }
  func.func @transform_0(%arg0: i32) -> (i32, i32) {
    %c0_i32 = arith.constant 0 : i32
    %c0_i32_0 = arith.constant 0 : i32
    return %arg0, %c0_i32 : i32, i32
  }
  func.func @transform_1(%arg0: i32) -> (i32, i32) {
    %c0_i32 = arith.constant 0 : i32
    %c0_i32_0 = arith.constant 0 : i32
    %c0_i32_1 = arith.constant 0 : i32
    return %c0_i32, %c0_i32_0 : i32, i32
  }
  func.func @transform_2(%arg0: i32) -> (i32, i32) {
    %c0_i32 = arith.constant 0 : i32
    %c0_i32_0 = arith.constant 0 : i32
    %c0_i32_1 = arith.constant 0 : i32
    return %c0_i32, %c0_i32_0 : i32, i32
  }
  func.func @transform_3(%arg0: i32) -> (i32, i32) {
    %c0_i32 = arith.constant 0 : i32
    %c0_i32_0 = arith.constant 0 : i32
    return %arg0, %c0_i32 : i32, i32
  }
}

</mosaic_0001>

<bundles_post_ra>
// kernel: tpu_custom_call.1
= control target key start
LH: loop header
LB: loop body
LE: loop exit
PB: predicated region body
PF: predicated region fallthrough
CT: control target
= control target key end

     0   :  { %8 = vsyncpa [#allocation3], 0  ;;  %s365_s0 = inlined_call_operand.hbm [shape: bf16[32,128], index: 0, kind: input, shape index: {}]   ;;  %s366_s1 = inlined_call_operand.hbm [shape: bf16[128,128], index: 1, kind: input, shape index: {}]   ;;  %s367_s2 = inlined_call_operand.vmem [shape: f32[1,128], index: 2, kind: input, shape index: {}]   ;;  %s368_s3 = inlined_call_operand.hbm [shape: f32[32,128], index: 3, kind: output, shape index: {}]  }
   0x1   :  { %9 = vsyncpa [#allocation6], 0 }
   0x2   :  { %10 = vsyncpa [#allocation4], 0  ;;  %s326_s12 = smov [#allocation2]  }
   0x3   :  { %s16_s13 = sshll.u32 %s326_s12, 4  ;;  %s17_s13 = int_to_ptr.vmem [resolvable:$true] %s16_s13 }
   0x4   :  { %s268_s14 = scalar_lea.vmem %s17_s13, 256  ;;  %p273_p1 = scmp.lt.s32.totalorder %s17_s13, %s17_s13 }
   0x5   :  { %p269_p0 = scmp.ne.s32.totalorder %s17_s13, %s268_s14  ;;  %p274_p2 = scmp.lt.s32.totalorder %s268_s14, %s268_s14 }
   0x7   :  { %p275_p3 = por %p274_p2, %p273_p1 }
   0x9   :  { %p276_p4 = pnand %p275_p3, %p269_p0 }
   0xb   :  { %279 = shalt.err (!%p276_p4)
}
   0xc   :  { %s327_s15 = smov 64   ;;  %s328_s16 = smov 4  }
   0xd   :  { %22 = dma.hbm_to_vmem [thread:$0]  %s365_s0, 256, %s17_s13, [#allocation3], %s327_s15, %s327_s15, %s328_s16  }
   0xe   :  { %s329_s19 = smov [#allocation5]  }
   0xf   :  { %s28_s20 = sshll.u32 %s329_s19, 4  ;;  %s29_s20 = int_to_ptr.vmem [resolvable:$true] %s28_s20 }
  0x10   :  { %s288_s21 = scalar_lea.vmem %s29_s20, 1024  ;;  %p293_p6 = scmp.lt.s32.totalorder %s29_s20, %s29_s20 }
  0x11   :  { %p289_p5 = scmp.ne.s32.totalorder %s29_s20, %s288_s21  ;;  %p294_p7 = scmp.lt.s32.totalorder %s288_s21, %s288_s21 }
  0x13   :  { %p295_p8 = por %p294_p7, %p293_p6 }
  0x15   :  { %p296_p9 = pnand %p295_p8, %p289_p5 }
  0x17   :  { %299 = shalt.err (!%p296_p9)
}
  0x18   :  { %34 = dma.hbm_to_vmem [thread:$0]  %s366_s1, 1024, %s29_s20, [#allocation6], %s327_s15, %s327_s15, %s328_s16  }
  0x19   :  { %320 = dma.done.wait [#allocation3], 256  }
  0x1a   :  { %321 = vsyncadd [#allocation3], 4294967040 }
  0x1b   :  { %322 = dma.done.wait [#allocation6], 1024  }
  0x1c   :  { %323 = vsyncadd [#allocation6], 4294966272  ;;  %v250_v0 = vld [vmem:[#allocation5 + $0x38] sm:$0xff]   ;;  %v251_v1 = vld [vmem:[#allocation5 + $0x30] sm:$0xff]   ;;  %s330_s24 = smov [#allocation7]  }
  0x1d   :  { %223 = vmatprep.subr.bf16.mxu0 %v250_v0  ;;  %v252_v2 = vld [vmem:[#allocation5 + $0x28] sm:$0xff]   ;;  %v253_v3 = vld [vmem:[#allocation5 + $0x20] sm:$0xff]   ;;  %v258_v4 = vld [vmem:[#allocation2] sm:$0xff]   ;;  %s189_s25 = sshll.u32 %s330_s24, 4  ;;  %s190_s25 = int_to_ptr.vmem [resolvable:$true] %s189_s25 }
  0x1e   :  { %224 = vmatpush3.bf16.msra.mxu0 %v250_v0  ;;  %239 = vmatprep.mubr.bf16.mxu0 %v258_v4  ;;  %v254_v5 = vld [vmem:[#allocation5 + $0x18] sm:$0xff]   ;;  %v255_v6 = vld [vmem:[#allocation5 + $0x10] sm:$0xff]   ;;  %v256_v7 = vld [vmem:[#allocation5 + $0x8] sm:$0xff]   ;;  %s300_s26 = scalar_lea.vmem %s190_s25, 512  ;;  %p305_p11 = scmp.lt.s32.totalorder %s190_s25, %s190_s25 }
  0x1f   :  { %225 = vmatprep.subr.bf16.mxu0 %v251_v1  ;;  %v257_v8 = vld [vmem:[#allocation5] sm:$0xff]   ;;  %v259_v9 = vld [vmem:[#allocation2 + $0x8] sm:$0xff]   ;;  %v202_v10 = vld [vmem:[%s367_s2] ss:$0 sm:$0xff]  ;;  %p301_p10 = scmp.ne.s32.totalorder %s190_s25, %s300_s26  ;;  %p306_p12 = scmp.lt.s32.totalorder %s300_s26, %s300_s26 }
  0x21   :  { %p307_p13 = por %p306_p12, %p305_p11 }
  0x22   :  { %226 = vmatpush3.bf16.msra.mxu0 %v251_v1 }
  0x23   :  { %227 = vmatprep.subr.bf16.mxu0 %v252_v2  ;;  %p308_p0 = pnand %p307_p13, %p301_p10 }
  0x26   :  { %228 = vmatpush3.bf16.msra.mxu0 %v252_v2 }
  0x27   :  { %229 = vmatprep.subr.bf16.mxu0 %v253_v3 }
  0x2a   :  { %230 = vmatpush3.bf16.msra.mxu0 %v253_v3 }
  0x2b   :  { %231 = vmatprep.subr.bf16.mxu0 %v254_v5 }
  0x2e   :  { %232 = vmatpush3.bf16.msra.mxu0 %v254_v5 }
  0x2f   :  { %233 = vmatprep.subr.bf16.mxu0 %v255_v6 }
  0x32   :  { %234 = vmatpush3.bf16.msra.mxu0 %v255_v6 }
  0x33   :  { %235 = vmatprep.subr.bf16.mxu0 %v256_v7 }
  0x36   :  { %236 = vmatpush3.bf16.msra.mxu0 %v256_v7 }
  0x37   :  { %237 = vmatprep.subr.bf16.mxu0 %v257_v8 }
  0x3a   :  { %238 = vmatpush3.bf16.msra.mxu0 %v257_v8 }
  0x3d   :  { %240 = vmatmul.mubr.bf16.vlgmr.msra.gmra.mxu0 %v259_v9 }
  0xfd   :  { %v241_v11 = vpop.f32.mrf.mxu0 }
  0xfe   :  { %v174_v12 = vadd.f32 %v241_v11, %v202_v10 }
  0xff   :  { %v165_v13 = vpop.f32.mrf.mxu0 }
 0x100   :  { %182 = vst [vmem:[#allocation7 + $0x10] sm:$0xff] %v174_v12  ;;  %v166_v14 = vadd.f32 %v202_v10, %v165_v13 }
 0x101   :  { %v242_v15 = vpop.f32.mrf.mxu0 }
 0x102   :  { %180 = vst [vmem:[#allocation7] sm:$0xff] %v166_v14  ;;  %v177_v16 = vadd.f32 %v242_v15, %v202_v10 }
 0x103   :  { %v168_v17 = vpop.f32.mrf.mxu0 }
 0x104   :  { %183 = vst [vmem:[#allocation7 + $0x18] sm:$0xff] %v177_v16  ;;  %v169_v18 = vadd.f32 %v202_v10, %v168_v17 }
 0x106   :  { %181 = vst [vmem:[#allocation7 + $0x8] sm:$0xff] %v169_v18 }
 0x107   :  { %311 = shalt.err (!%p308_p0)
}
 0x108   :  { %s331_s2 = smov 128   ;;  %s332_s27 = smov 8  }
 0x109   :  { %195 = dma.vmem_to_hbm [thread:$0]  %s190_s25, 512, %s368_s3, [#allocation4], %s331_s2, %s331_s2, %s332_s27  }
 0x10a   :  { %324 = dma.done.wait [#allocation4], 512  }
 0x10b   :  { %325 = vsyncadd [#allocation4], 4294966784 }
 0x10c   :  { %199 = vsyncpa [#allocation3], 1 }
 0x10d   :  { %200 = vsyncpa [#allocation6], 1 }
 0x10e   :  { %201 = vsyncpa [#allocation4], 1 }

</bundles_post_ra>
